<compile_context>
chip_gen: v7x
topology: tpu7x:2x2x1
jax: 0.10.0
libtpu: 0.0.40
codegen_flags: <defaults>
</compile_context>

<pallas_src>
import functools
import math

import jax
import jax.numpy as jnp
from jax.experimental import pallas as pl
from jax.experimental.pallas import tpu as pltpu

_EPS = 1e-7          # same eps as torchvision box losses
_LANES = 128
_SUBLANES = 8


def _fast_div(num, den):
    """num / den via EUP approx reciprocal + one Newton-Raphson refinement.

    The NR step restores ~f32 accuracy while keeping the heavy part of the
    divide on the (otherwise idle) EUP slot instead of the VPU.  Only used
    where `den` is eps-bounded away from zero (or the result is discarded by
    a select).
    """
    r = pl.reciprocal(den, approx=True)
    r = r * (2.0 - den * r)
    return num * r


def _atan32(x):
    """Cephes-style float32 arctan using only VPU/EUP-friendly elementwise ops."""
    sign = jnp.where(x < 0.0, -1.0, 1.0)
    ax = jnp.abs(x)
    t3p8 = 2.414213562373095    # tan(3*pi/8)
    tp8 = 0.4142135623730951    # tan(pi/8)
    big = ax > t3p8
    mid = jnp.logical_and(ax > tp8, jnp.logical_not(big))
    y0 = jnp.where(big, math.pi / 2.0, jnp.where(mid, math.pi / 4.0, 0.0))
    # Both denominators are bounded away from zero on their selected lanes and
    # mis-selected lanes are discarded by the jnp.where, so the EUP
    # approx-reciprocal + NR path is safe here (moves 2 divides off the VPU).
    xr = jnp.where(big, -_fast_div(1.0, ax + 1e-30),
                   jnp.where(mid, _fast_div(ax - 1.0, ax + 1.0), ax))
    z = xr * xr
    poly = ((((8.05374449538e-2 * z - 1.38776856032e-1) * z
              + 1.99777106478e-1) * z - 3.33329491539e-1) * z * xr + xr)
    return sign * (y0 + poly)


def _box_loss_kernel(n_ref, boxes_ref, out_ref):
    """boxes_ref: (8, S, 128) coordinate planes.

    Planes 0-3: pred x1, y1, x2, y2.  Planes 4-7: targ x1, y1, x2, y2.
    Padded slots beyond n are zero.  Output (4, 1): [mse, diou, ciou, giou].
    """
    n = n_ref[0]                              # int32: number of real boxes
    b = boxes_ref[...]                        # (8, S, 128) f32
    s = b.shape[1]

    # One validity mask over the (S, 128) box slots, built once and reused.
    sub = jax.lax.broadcasted_iota(jnp.int32, (s, _LANES), 0)
    lane = jax.lax.broadcasted_iota(jnp.int32, (s, _LANES), 1)
    valid = (sub * _LANES + lane) < n         # (S, 128) bool
    maskf = valid.astype(jnp.float32)

    p = b[0:4]                                # (4, S, 128) pred  [x1,y1,x2,y2]
    g = b[4:8]                                # (4, S, 128) targ

    # ---- paired (x, y) slabs: intersection / enclosing box / width-height ----
    is1 = jnp.maximum(p[0:2], g[0:2])         # intersection top-left   (2,S,128)
    is2 = jnp.minimum(p[2:4], g[2:4])         # intersection bottom-right
    c1 = jnp.minimum(p[0:2], g[0:2])          # enclosing top-left
    c2 = jnp.maximum(p[2:4], g[2:4])          # enclosing bottom-right

    wh_p = p[2:4] - p[0:2]                    # (2,S,128) pred (w, h)
    wh_g = g[2:4] - g[0:2]                    # (2,S,128) targ (w, h)
    dis = is2 - is1                           # (2,S,128)
    whc = c2 - c1                             # (2,S,128) enclosing (w, h)

    # ---- IoU (torchvision _loss_inter_union) ----
    pos = dis > 0.0
    inter = jnp.where(pos[0] & pos[1], dis[0] * dis[1], 0.0)    # (S,128)
    union = wh_p[0] * wh_p[1] + wh_g[0] * wh_g[1] - inter
    iou = _fast_div(inter, union + _EPS)

    # ---- generalized box IoU loss ----
    area_c = whc[0] * whc[1]
    giou_l = 1.0 - iou + _fast_div(area_c - union, area_c + _EPS)

    # ---- distance box IoU loss ----
    diag_sq = whc[0] * whc[0] + whc[1] * whc[1] + _EPS
    cd = (p[0:2] + p[2:4]) - (g[0:2] + g[2:4])      # 2 * (center_p - center_g)
    cdist_sq = 0.25 * (cd[0] * cd[0] + cd[1] * cd[1])
    diou_l = 1.0 - iou + _fast_div(cdist_sq, diag_sq)

    # ---- complete box IoU loss: ONE fused atan on a (2,S,128) slab ----
    widths = jnp.concatenate([wh_g[0:1], wh_p[0:1]], axis=0)     # [w_g; w_p]
    heights = jnp.concatenate([wh_g[1:2], wh_p[1:2]], axis=0)    # [h_g; h_p]
    # Pad slots have w == h == 0; guard only the denominator there (0/1 -> 0)
    # so the atan stays finite.  Real (possibly degenerate) boxes keep plain
    # '/' semantics, matching torch.
    heights = jnp.where(valid[None], heights, 1.0)
    at = _atan32(widths / heights)
    dv = at[0] - at[1]
    v = (4.0 / (math.pi ** 2)) * (dv * dv)
    alpha = _fast_div(v, 1.0 - iou + v + _EPS)        # (alpha is no-grad in torch)
    ciou_l = diou_l + alpha * v

    # ---- fused masked reductions ----
    d = p - g                                          # (4,S,128)
    se = jnp.sum(d * d, axis=0)                        # (S,128) per-box SSE

    stacked = jnp.stack([se, diou_l, ciou_l, giou_l], axis=0)    # (4,S,128)
    masked = stacked * maskf[None]
    per_lane = jnp.sum(masked, axis=1)                 # (4, 128)
    sums = jnp.sum(per_lane, axis=1, keepdims=True)    # (4, 1)

    # Row 0 holds the SSE -> divide by 4n for the MSE; other rows are sums.
    n_f = jnp.maximum(n, 1).astype(jnp.float32)        # guard n == 0 (no NaN)
    row = jax.lax.broadcasted_iota(jnp.int32, (4, 1), 0)
    denom = jnp.where(row == 0, 4.0 * n_f, 1.0)
    out_ref[...] = sums / denom


def _losses_from_kernel(pred_params, targ_params):
    """Pack boxes coordinate-planar and run the single Pallas kernel."""
    n = pred_params.shape[0]
    if pred_params.shape != (n, 4) or targ_params.shape != (n, 4):
        raise ValueError("expected (N, 4) xyxy boxes")

    s = max(1, -(-n // _LANES))                 # ceil(n / 128)
    s = -(-s // _SUBLANES) * _SUBLANES          # round sublanes up to 8
    total = s * _LANES

    # (n, 8) -> (8, n) -> (8, S*128) -> (8, S, 128): each coordinate is a full
    # (S, 128) plane, so every VPU op in the kernel works on whole vregs.
    packed = jnp.concatenate([pred_params, targ_params], axis=1)
    packed = packed.astype(jnp.float32).T
    packed = jnp.pad(packed, ((0, 0), (0, total - n)))
    packed = packed.reshape(8, s, _LANES)
    n_arr = jnp.full((1,), n, jnp.int32)

    out = pl.pallas_call(
        _box_loss_kernel,
        out_shape=jax.ShapeDtypeStruct((4, 1), jnp.float32),
        in_specs=[
            pl.BlockSpec(memory_space=pltpu.MemorySpace.SMEM),   # n (scalar)
            pl.BlockSpec(memory_space=pltpu.MemorySpace.VMEM),   # box planes
        ],
        out_specs=pl.BlockSpec(memory_space=pltpu.MemorySpace.VMEM),
    )(n_arr, packed)

    return dict(mse=out[0, 0], dbiou=out[1, 0], cbiou=out[2, 0], gbiou=out[3, 0])


@functools.partial(jax.jit, static_argnames=('objective',))
def _localizer_loss(pred_params, targ_params, *, objective):
    """One executable: kernel + objective combination + dict assembly."""
    losses = _losses_from_kernel(pred_params, targ_params)
    loss = jnp.zeros((), jnp.float32)
    for obj in objective.split('+'):
        if obj not in losses:
            raise ValueError(f"Objective '{obj}' not recognized.")
        loss = loss + losses[obj]
    out = {'loss': jnp.reshape(loss, (1,))}            # matches torch.zeros(1)
    out.update({f'{k}_Loss': v for k, v in losses.items()})
    return out


class Localizer:
    """JAX/Pallas port of the PyTorch Localizer base class."""

    def __init__(self, name: str, validate_boxes: bool = False) -> None:
        self.name = name
        # The PyTorch asserts force blocking device->host syncs and break jit;
        # keep them as an opt-in debug check (single fused sync when enabled).
        self.validate_boxes = validate_boxes

    def forward(self, x, **kwargs):
        # TODO(synk): forward() is abstract in the reference module; nothing to lower.
        raise NotImplementedError

    def loss_function(self, pred_params, targ_params,
                      objective: str = 'cbiou+dbiou') -> dict:
        if self.validate_boxes:
            ok = jnp.all((pred_params[:, 0] <= pred_params[:, 2])
                         & (pred_params[:, 1] <= pred_params[:, 3])
                         & (targ_params[:, 0] <= targ_params[:, 2])
                         & (targ_params[:, 1] <= targ_params[:, 3]))
            assert bool(ok), 'BBs are invalid.'
        return _localizer_loss(pred_params, targ_params, objective=objective)


# ---------------------------------------------------------------------------
# Pure-JAX reference (mirrors torchvision box-loss implementations) for checks.
# ---------------------------------------------------------------------------
def _ref_losses(pred, targ):
    eps = _EPS
    x1, y1, x2, y2 = [pred[:, i] for i in range(4)]
    x1g, y1g, x2g, y2g = [targ[:, i] for i in range(4)]

    xkis1 = jnp.maximum(x1, x1g); ykis1 = jnp.maximum(y1, y1g)
    xkis2 = jnp.minimum(x2, x2g); ykis2 = jnp.minimum(y2, y2g)
    inter = jnp.where((ykis2 > ykis1) & (xkis2 > xkis1),
                      (xkis2 - xkis1) * (ykis2 - ykis1), 0.0)
    union = (x2 - x1) * (y2 - y1) + (x2g - x1g) * (y2g - y1g) - inter
    iou = inter / (union + eps)

    xc1 = jnp.minimum(x1, x1g); yc1 = jnp.minimum(y1, y1g)
    xc2 = jnp.maximum(x2, x2g); yc2 = jnp.maximum(y2, y2g)

    area_c = (xc2 - xc1) * (yc2 - yc1)
    giou_loss = 1.0 - (iou - (area_c - union) / (area_c + eps))

    diag_sq = (xc2 - xc1) ** 2 + (yc2 - yc1) ** 2 + eps
    cdist_sq = (((x2 + x1) / 2 - (x1g + x2g) / 2) ** 2
                + ((y2 + y1) / 2 - (y1g + y2g) / 2) ** 2)
    diou_loss = 1.0 - iou + cdist_sq / diag_sq

    w_p = x2 - x1; h_p = y2 - y1
    w_g = x2g - x1g; h_g = y2g - y1g
    v = (4.0 / (math.pi ** 2)) * (jnp.arctan(w_g / h_g) - jnp.arctan(w_p / h_p)) ** 2
    alpha = v / (1.0 - iou + v + eps)
    ciou_loss = diou_loss + alpha * v

    return dict(mse=jnp.mean((pred - targ) ** 2),
                dbiou=jnp.sum(diou_loss),
                cbiou=jnp.sum(ciou_loss),
                gbiou=jnp.sum(giou_loss))


if __name__ == "__main__":
    key = jax.random.PRNGKey(0)

    def make_boxes(ka, kb, n):
        xy1 = jax.random.uniform(ka, (n, 2), minval=0.0, maxval=0.5)
        wh = jax.random.uniform(kb, (n, 2), minval=0.05, maxval=0.5)
        return jnp.concatenate([xy1, xy1 + wh], axis=1).astype(jnp.float32)

    model = Localizer(name="pallas_localizer")   # validate_boxes off => no host syncs

    # n=8 / n=5: small-shape checks; n=300: exercises the multi-row mask path.
    for n in (8, 5, 300):
        k1, k2, k3, k4, key = jax.random.split(key, 5)
        pred = make_boxes(k1, k2, n)    # (n, 4) valid xyxy boxes
        targ = make_boxes(k3, k4, n)

        out = model.loss_function(pred, targ, objective='cbiou+dbiou')
        jax.block_until_ready(out['loss'])

        ref = _ref_losses(pred, targ)
        ref_loss = ref['cbiou'] + ref['dbiou']
        assert jnp.allclose(out['mse_Loss'], ref['mse'], rtol=2e-4, atol=1e-5)
        assert jnp.allclose(out['dbiou_Loss'], ref['dbiou'], rtol=2e-4, atol=1e-5)
        assert jnp.allclose(out['cbiou_Loss'], ref['cbiou'], rtol=2e-4, atol=1e-5)
        assert jnp.allclose(out['gbiou_Loss'], ref['gbiou'], rtol=2e-4, atol=1e-5)
        assert jnp.allclose(out['loss'][0], ref_loss, rtol=2e-4, atol=1e-5)

    print("KERNEL_OK")
</pallas_src>

<mosaic_0001>
module attributes {stable_mosaic.version = 11 : i64} {
  func.func @_box_loss_kernel(%arg0: memref<1xi32, #tpu.memory_space<smem>>, %arg1: memref<8x8x128xf32, #tpu.memory_space<vmem>>, %arg2: memref<4x1xf32, #tpu.memory_space<vmem>>) attributes {dimension_semantics = [], scalar_prefetch = 0 : i64, scratch_operands = 0 : i64, tpu.core_type = #tpu.core_type<tc>} {
    %c0 = arith.constant 0 : index
    %0 = memref.load %arg0[%c0] : memref<1xi32, #tpu.memory_space<smem>>
    %c0_0 = arith.constant 0 : index
    %c0_1 = arith.constant 0 : index
    %c0_2 = arith.constant 0 : index
    %1 = vector.load %arg1[%c0_0, %c0_1, %c0_2] : memref<8x8x128xf32, #tpu.memory_space<vmem>>, vector<8x8x128xf32>
    %2 = tpu.iota {dimensions = array<i32: 0>} : vector<8x128xi32>
    %3 = tpu.iota {dimensions = array<i32: 1>} : vector<8x128xi32>
    %c128_i32 = arith.constant 128 : i32
    %4 = vector.broadcast %c128_i32 : i32 to vector<8x128xi32>
    %5 = arith.muli %2, %4 : vector<8x128xi32>
    %6 = arith.addi %5, %3 : vector<8x128xi32>
    %7 = vector.broadcast %0 : i32 to vector<8x128xi32>
    %8 = arith.cmpi slt, %6, %7 : vector<8x128xi32>
    %9 = arith.extui %8 : vector<8x128xi1> to vector<8x128xi32>
    %10 = arith.sitofp %9 : vector<8x128xi32> to vector<8x128xf32>
    %11 = vector.extract_strided_slice %1 {offsets = [0, 0, 0], sizes = [4, 8, 128], strides = [1, 1, 1]} : vector<8x8x128xf32> to vector<4x8x128xf32>
    %12 = vector.extract_strided_slice %1 {offsets = [4, 0, 0], sizes = [4, 8, 128], strides = [1, 1, 1]} : vector<8x8x128xf32> to vector<4x8x128xf32>
    %13 = vector.extract_strided_slice %11 {offsets = [0, 0, 0], sizes = [2, 8, 128], strides = [1, 1, 1]} : vector<4x8x128xf32> to vector<2x8x128xf32>
    %14 = vector.extract_strided_slice %12 {offsets = [0, 0, 0], sizes = [2, 8, 128], strides = [1, 1, 1]} : vector<4x8x128xf32> to vector<2x8x128xf32>
    %15 = arith.maximumf %13, %14 : vector<2x8x128xf32>
    %16 = vector.extract_strided_slice %11 {offsets = [2, 0, 0], sizes = [2, 8, 128], strides = [1, 1, 1]} : vector<4x8x128xf32> to vector<2x8x128xf32>
    %17 = vector.extract_strided_slice %12 {offsets = [2, 0, 0], sizes = [2, 8, 128], strides = [1, 1, 1]} : vector<4x8x128xf32> to vector<2x8x128xf32>
    %18 = arith.minimumf %16, %17 : vector<2x8x128xf32>
    %19 = vector.extract_strided_slice %11 {offsets = [0, 0, 0], sizes = [2, 8, 128], strides = [1, 1, 1]} : vector<4x8x128xf32> to vector<2x8x128xf32>
    %20 = vector.extract_strided_slice %12 {offsets = [0, 0, 0], sizes = [2, 8, 128], strides = [1, 1, 1]} : vector<4x8x128xf32> to vector<2x8x128xf32>
    %21 = arith.minimumf %19, %20 : vector<2x8x128xf32>
    %22 = vector.extract_strided_slice %11 {offsets = [2, 0, 0], sizes = [2, 8, 128], strides = [1, 1, 1]} : vector<4x8x128xf32> to vector<2x8x128xf32>
    %23 = vector.extract_strided_slice %12 {offsets = [2, 0, 0], sizes = [2, 8, 128], strides = [1, 1, 1]} : vector<4x8x128xf32> to vector<2x8x128xf32>
    %24 = arith.maximumf %22, %23 : vector<2x8x128xf32>
    %25 = vector.extract_strided_slice %11 {offsets = [2, 0, 0], sizes = [2, 8, 128], strides = [1, 1, 1]} : vector<4x8x128xf32> to vector<2x8x128xf32>
    %26 = vector.extract_strided_slice %11 {offsets = [0, 0, 0], sizes = [2, 8, 128], strides = [1, 1, 1]} : vector<4x8x128xf32> to vector<2x8x128xf32>
    %27 = arith.subf %25, %26 : vector<2x8x128xf32>
    %28 = vector.extract_strided_slice %12 {offsets = [2, 0, 0], sizes = [2, 8, 128], strides = [1, 1, 1]} : vector<4x8x128xf32> to vector<2x8x128xf32>
    %29 = vector.extract_strided_slice %12 {offsets = [0, 0, 0], sizes = [2, 8, 128], strides = [1, 1, 1]} : vector<4x8x128xf32> to vector<2x8x128xf32>
    %30 = arith.subf %28, %29 : vector<2x8x128xf32>
    %31 = arith.subf %18, %15 : vector<2x8x128xf32>
    %32 = arith.subf %24, %21 : vector<2x8x128xf32>
    %cst = arith.constant 0.000000e+00 : f32
    %33 = vector.broadcast %cst : f32 to vector<2x8x128xf32>
    %34 = arith.cmpf ogt, %31, %33 : vector<2x8x128xf32>
    %35 = vector.extract_strided_slice %34 {offsets = [0, 0, 0], sizes = [1, 8, 128], strides = [1, 1, 1]} : vector<2x8x128xi1> to vector<1x8x128xi1>
    %36 = vector.shape_cast %35 : vector<1x8x128xi1> to vector<8x128xi1>
    %37 = vector.extract_strided_slice %34 {offsets = [1, 0, 0], sizes = [1, 8, 128], strides = [1, 1, 1]} : vector<2x8x128xi1> to vector<1x8x128xi1>
    %38 = vector.shape_cast %37 : vector<1x8x128xi1> to vector<8x128xi1>
    %39 = arith.andi %36, %38 : vector<8x128xi1>
    %40 = vector.extract_strided_slice %31 {offsets = [0, 0, 0], sizes = [1, 8, 128], strides = [1, 1, 1]} : vector<2x8x128xf32> to vector<1x8x128xf32>
    %41 = vector.shape_cast %40 : vector<1x8x128xf32> to vector<8x128xf32>
    %42 = vector.extract_strided_slice %31 {offsets = [1, 0, 0], sizes = [1, 8, 128], strides = [1, 1, 1]} : vector<2x8x128xf32> to vector<1x8x128xf32>
    %43 = vector.shape_cast %42 : vector<1x8x128xf32> to vector<8x128xf32>
    %44 = arith.mulf %41, %43 : vector<8x128xf32>
    %cst_3 = arith.constant 0.000000e+00 : f32
    %45 = vector.broadcast %cst_3 : f32 to vector<8x128xf32>
    %46 = arith.select %39, %44, %45 : vector<8x128xi1>, vector<8x128xf32>
    %47 = vector.extract_strided_slice %27 {offsets = [0, 0, 0], sizes = [1, 8, 128], strides = [1, 1, 1]} : vector<2x8x128xf32> to vector<1x8x128xf32>
    %48 = vector.shape_cast %47 : vector<1x8x128xf32> to vector<8x128xf32>
    %49 = vector.extract_strided_slice %27 {offsets = [1, 0, 0], sizes = [1, 8, 128], strides = [1, 1, 1]} : vector<2x8x128xf32> to vector<1x8x128xf32>
    %50 = vector.shape_cast %49 : vector<1x8x128xf32> to vector<8x128xf32>
    %51 = arith.mulf %48, %50 : vector<8x128xf32>
    %52 = vector.extract_strided_slice %30 {offsets = [0, 0, 0], sizes = [1, 8, 128], strides = [1, 1, 1]} : vector<2x8x128xf32> to vector<1x8x128xf32>
    %53 = vector.shape_cast %52 : vector<1x8x128xf32> to vector<8x128xf32>
    %54 = vector.extract_strided_slice %30 {offsets = [1, 0, 0], sizes = [1, 8, 128], strides = [1, 1, 1]} : vector<2x8x128xf32> to vector<1x8x128xf32>
    %55 = vector.shape_cast %54 : vector<1x8x128xf32> to vector<8x128xf32>
    %56 = arith.mulf %53, %55 : vector<8x128xf32>
    %57 = arith.addf %51, %56 : vector<8x128xf32>
    %58 = arith.subf %57, %46 : vector<8x128xf32>
    %cst_4 = arith.constant 1.000000e-07 : f32
    %59 = vector.broadcast %cst_4 : f32 to vector<8x128xf32>
    %60 = arith.addf %58, %59 : vector<8x128xf32>
    %61 = tpu.reciprocal %60 {approx = true} : vector<8x128xf32> -> vector<8x128xf32>
    %62 = arith.mulf %60, %61 : vector<8x128xf32>
    %cst_5 = arith.constant 2.000000e+00 : f32
    %63 = vector.broadcast %cst_5 : f32 to vector<8x128xf32>
    %64 = arith.subf %63, %62 : vector<8x128xf32>
    %65 = arith.mulf %61, %64 : vector<8x128xf32>
    %66 = arith.mulf %46, %65 : vector<8x128xf32>
    %67 = vector.extract_strided_slice %32 {offsets = [0, 0, 0], sizes = [1, 8, 128], strides = [1, 1, 1]} : vector<2x8x128xf32> to vector<1x8x128xf32>
    %68 = vector.shape_cast %67 : vector<1x8x128xf32> to vector<8x128xf32>
    %69 = vector.extract_strided_slice %32 {offsets = [1, 0, 0], sizes = [1, 8, 128], strides = [1, 1, 1]} : vector<2x8x128xf32> to vector<1x8x128xf32>
    %70 = vector.shape_cast %69 : vector<1x8x128xf32> to vector<8x128xf32>
    %71 = arith.mulf %68, %70 : vector<8x128xf32>
    %cst_6 = arith.constant 1.000000e+00 : f32
    %72 = vector.broadcast %cst_6 : f32 to vector<8x128xf32>
    %73 = arith.subf %72, %66 : vector<8x128xf32>
    %74 = arith.subf %71, %58 : vector<8x128xf32>
    %cst_7 = arith.constant 1.000000e-07 : f32
    %75 = vector.broadcast %cst_7 : f32 to vector<8x128xf32>
    %76 = arith.addf %71, %75 : vector<8x128xf32>
    %77 = tpu.reciprocal %76 {approx = true} : vector<8x128xf32> -> vector<8x128xf32>
    %78 = arith.mulf %76, %77 : vector<8x128xf32>
    %cst_8 = arith.constant 2.000000e+00 : f32
    %79 = vector.broadcast %cst_8 : f32 to vector<8x128xf32>
    %80 = arith.subf %79, %78 : vector<8x128xf32>
    %81 = arith.mulf %77, %80 : vector<8x128xf32>
    %82 = arith.mulf %74, %81 : vector<8x128xf32>
    %83 = arith.addf %73, %82 : vector<8x128xf32>
    %84 = vector.extract_strided_slice %32 {offsets = [0, 0, 0], sizes = [1, 8, 128], strides = [1, 1, 1]} : vector<2x8x128xf32> to vector<1x8x128xf32>
    %85 = vector.shape_cast %84 : vector<1x8x128xf32> to vector<8x128xf32>
    %86 = vector.extract_strided_slice %32 {offsets = [0, 0, 0], sizes = [1, 8, 128], strides = [1, 1, 1]} : vector<2x8x128xf32> to vector<1x8x128xf32>
    %87 = vector.shape_cast %86 : vector<1x8x128xf32> to vector<8x128xf32>
    %88 = arith.mulf %85, %87 : vector<8x128xf32>
    %89 = vector.extract_strided_slice %32 {offsets = [1, 0, 0], sizes = [1, 8, 128], strides = [1, 1, 1]} : vector<2x8x128xf32> to vector<1x8x128xf32>
    %90 = vector.shape_cast %89 : vector<1x8x128xf32> to vector<8x128xf32>
    %91 = vector.extract_strided_slice %32 {offsets = [1, 0, 0], sizes = [1, 8, 128], strides = [1, 1, 1]} : vector<2x8x128xf32> to vector<1x8x128xf32>
    %92 = vector.shape_cast %91 : vector<1x8x128xf32> to vector<8x128xf32>
    %93 = arith.mulf %90, %92 : vector<8x128xf32>
    %94 = arith.addf %88, %93 : vector<8x128xf32>
    %cst_9 = arith.constant 1.000000e-07 : f32
    %95 = vector.broadcast %cst_9 : f32 to vector<8x128xf32>
    %96 = arith.addf %94, %95 : vector<8x128xf32>
    %97 = vector.extract_strided_slice %11 {offsets = [0, 0, 0], sizes = [2, 8, 128], strides = [1, 1, 1]} : vector<4x8x128xf32> to vector<2x8x128xf32>
    %98 = vector.extract_strided_slice %11 {offsets = [2, 0, 0], sizes = [2, 8, 128], strides = [1, 1, 1]} : vector<4x8x128xf32> to vector<2x8x128xf32>
    %99 = arith.addf %97, %98 : vector<2x8x128xf32>
    %100 = vector.extract_strided_slice %12 {offsets = [0, 0, 0], sizes = [2, 8, 128], strides = [1, 1, 1]} : vector<4x8x128xf32> to vector<2x8x128xf32>
    %101 = vector.extract_strided_slice %12 {offsets = [2, 0, 0], sizes = [2, 8, 128], strides = [1, 1, 1]} : vector<4x8x128xf32> to vector<2x8x128xf32>
    %102 = arith.addf %100, %101 : vector<2x8x128xf32>
    %103 = arith.subf %99, %102 : vector<2x8x128xf32>
    %104 = vector.extract_strided_slice %103 {offsets = [0, 0, 0], sizes = [1, 8, 128], strides = [1, 1, 1]} : vector<2x8x128xf32> to vector<1x8x128xf32>
    %105 = vector.shape_cast %104 : vector<1x8x128xf32> to vector<8x128xf32>
    %106 = vector.extract_strided_slice %103 {offsets = [0, 0, 0], sizes = [1, 8, 128], strides = [1, 1, 1]} : vector<2x8x128xf32> to vector<1x8x128xf32>
    %107 = vector.shape_cast %106 : vector<1x8x128xf32> to vector<8x128xf32>
    %108 = arith.mulf %105, %107 : vector<8x128xf32>
    %109 = vector.extract_strided_slice %103 {offsets = [1, 0, 0], sizes = [1, 8, 128], strides = [1, 1, 1]} : vector<2x8x128xf32> to vector<1x8x128xf32>
    %110 = vector.shape_cast %109 : vector<1x8x128xf32> to vector<8x128xf32>
    %111 = vector.extract_strided_slice %103 {offsets = [1, 0, 0], sizes = [1, 8, 128], strides = [1, 1, 1]} : vector<2x8x128xf32> to vector<1x8x128xf32>
    %112 = vector.shape_cast %111 : vector<1x8x128xf32> to vector<8x128xf32>
    %113 = arith.mulf %110, %112 : vector<8x128xf32>
    %114 = arith.addf %108, %113 : vector<8x128xf32>
    %cst_10 = arith.constant 2.500000e-01 : f32
    %115 = vector.broadcast %cst_10 : f32 to vector<8x128xf32>
    %116 = arith.mulf %115, %114 : vector<8x128xf32>
    %cst_11 = arith.constant 1.000000e+00 : f32
    %117 = vector.broadcast %cst_11 : f32 to vector<8x128xf32>
    %118 = arith.subf %117, %66 : vector<8x128xf32>
    %119 = tpu.reciprocal %96 {approx = true} : vector<8x128xf32> -> vector<8x128xf32>
    %120 = arith.mulf %96, %119 : vector<8x128xf32>
    %cst_12 = arith.constant 2.000000e+00 : f32
    %121 = vector.broadcast %cst_12 : f32 to vector<8x128xf32>
    %122 = arith.subf %121, %120 : vector<8x128xf32>
    %123 = arith.mulf %119, %122 : vector<8x128xf32>
    %124 = arith.mulf %116, %123 : vector<8x128xf32>
    %125 = arith.addf %118, %124 : vector<8x128xf32>
    %126 = vector.extract_strided_slice %30 {offsets = [0, 0, 0], sizes = [1, 8, 128], strides = [1, 1, 1]} : vector<2x8x128xf32> to vector<1x8x128xf32>
    %127 = vector.extract_strided_slice %27 {offsets = [0, 0, 0], sizes = [1, 8, 128], strides = [1, 1, 1]} : vector<2x8x128xf32> to vector<1x8x128xf32>
    %128 = tpu.concatenate %126, %127 in 0 : vector<1x8x128xf32>, vector<1x8x128xf32> -> vector<2x8x128xf32>
    %129 = vector.extract_strided_slice %30 {offsets = [1, 0, 0], sizes = [1, 8, 128], strides = [1, 1, 1]} : vector<2x8x128xf32> to vector<1x8x128xf32>
    %130 = vector.extract_strided_slice %27 {offsets = [1, 0, 0], sizes = [1, 8, 128], strides = [1, 1, 1]} : vector<2x8x128xf32> to vector<1x8x128xf32>
    %131 = tpu.concatenate %129, %130 in 0 : vector<1x8x128xf32>, vector<1x8x128xf32> -> vector<2x8x128xf32>
    %132 = vector.shape_cast %8 : vector<8x128xi1> to vector<1x8x128xi1>
    %cst_13 = arith.constant 1.000000e+00 : f32
    %133 = vector.shape_cast %132 : vector<1x8x128xi1> to vector<1x8x128xi1>
    %134 = vector.broadcast %133 : vector<1x8x128xi1> to vector<2x8x128xi1>
    %135 = vector.broadcast %cst_13 : f32 to vector<2x8x128xf32>
    %136 = arith.select %134, %131, %135 : vector<2x8x128xi1>, vector<2x8x128xf32>
    %137 = arith.divf %128, %136 : vector<2x8x128xf32>
    %cst_14 = arith.constant 0.000000e+00 : f32
    %138 = vector.broadcast %cst_14 : f32 to vector<2x8x128xf32>
    %139 = arith.cmpf olt, %137, %138 : vector<2x8x128xf32>
    %cst_15 = arith.constant -1.000000e+00 : f32
    %cst_16 = arith.constant 1.000000e+00 : f32
    %140 = vector.broadcast %cst_15 : f32 to vector<2x8x128xf32>
    %141 = vector.broadcast %cst_16 : f32 to vector<2x8x128xf32>
    %142 = arith.select %139, %140, %141 : vector<2x8x128xi1>, vector<2x8x128xf32>
    %143 = math.absf %137 : vector<2x8x128xf32>
    %cst_17 = arith.constant 2.41421366 : f32
    %144 = vector.broadcast %cst_17 : f32 to vector<2x8x128xf32>
    %145 = arith.cmpf ogt, %143, %144 : vector<2x8x128xf32>
    %cst_18 = arith.constant 0.414213568 : f32
    %146 = vector.broadcast %cst_18 : f32 to vector<2x8x128xf32>
    %147 = arith.cmpf ogt, %143, %146 : vector<2x8x128xf32>
    %cst_19 = arith.constant dense<true> : vector<2x8x128xi1>
    %148 = arith.xori %145, %cst_19 : vector<2x8x128xi1>
    %149 = arith.andi %147, %148 : vector<2x8x128xi1>
    %cst_20 = arith.constant 0.785398185 : f32
    %cst_21 = arith.constant 0.000000e+00 : f32
    %150 = vector.broadcast %cst_20 : f32 to vector<2x8x128xf32>
    %151 = vector.broadcast %cst_21 : f32 to vector<2x8x128xf32>
    %152 = arith.select %149, %150, %151 : vector<2x8x128xi1>, vector<2x8x128xf32>
    %cst_22 = arith.constant 1.57079637 : f32
    %153 = vector.broadcast %cst_22 : f32 to vector<2x8x128xf32>
    %154 = arith.select %145, %153, %152 : vector<2x8x128xi1>, vector<2x8x128xf32>
    %cst_23 = arith.constant 1.000000e-30 : f32
    %155 = vector.broadcast %cst_23 : f32 to vector<2x8x128xf32>
    %156 = arith.addf %143, %155 : vector<2x8x128xf32>
    %157 = tpu.reciprocal %156 {approx = true} : vector<2x8x128xf32> -> vector<2x8x128xf32>
    %158 = arith.mulf %156, %157 : vector<2x8x128xf32>
    %cst_24 = arith.constant 2.000000e+00 : f32
    %159 = vector.broadcast %cst_24 : f32 to vector<2x8x128xf32>
    %160 = arith.subf %159, %158 : vector<2x8x128xf32>
    %161 = arith.mulf %157, %160 : vector<2x8x128xf32>
    %cst_25 = arith.constant 1.000000e+00 : f32
    %162 = vector.broadcast %cst_25 : f32 to vector<2x8x128xf32>
    %163 = arith.mulf %162, %161 : vector<2x8x128xf32>
    %cst_26 = arith.constant 0.000000e+00 : f32
    %164 = vector.broadcast %cst_26 : f32 to vector<2x8x128xf32>
    %165 = arith.subf %164, %163 : vector<2x8x128xf32>
    %cst_27 = arith.constant 1.000000e+00 : f32
    %166 = vector.broadcast %cst_27 : f32 to vector<2x8x128xf32>
    %167 = arith.subf %143, %166 : vector<2x8x128xf32>
    %cst_28 = arith.constant 1.000000e+00 : f32
    %168 = vector.broadcast %cst_28 : f32 to vector<2x8x128xf32>
    %169 = arith.addf %143, %168 : vector<2x8x128xf32>
    %170 = tpu.reciprocal %169 {approx = true} : vector<2x8x128xf32> -> vector<2x8x128xf32>
    %171 = arith.mulf %169, %170 : vector<2x8x128xf32>
    %cst_29 = arith.constant 2.000000e+00 : f32
    %172 = vector.broadcast %cst_29 : f32 to vector<2x8x128xf32>
    %173 = arith.subf %172, %171 : vector<2x8x128xf32>
    %174 = arith.mulf %170, %173 : vector<2x8x128xf32>
    %175 = arith.mulf %167, %174 : vector<2x8x128xf32>
    %176 = arith.select %149, %175, %143 : vector<2x8x128xi1>, vector<2x8x128xf32>
    %177 = arith.select %145, %165, %176 : vector<2x8x128xi1>, vector<2x8x128xf32>
    %178 = arith.mulf %177, %177 : vector<2x8x128xf32>
    %cst_30 = arith.constant 0.0805374458 : f32
    %179 = vector.broadcast %cst_30 : f32 to vector<2x8x128xf32>
    %180 = arith.mulf %179, %178 : vector<2x8x128xf32>
    %cst_31 = arith.constant 0.138776854 : f32
    %181 = vector.broadcast %cst_31 : f32 to vector<2x8x128xf32>
    %182 = arith.subf %180, %181 : vector<2x8x128xf32>
    %183 = arith.mulf %182, %178 : vector<2x8x128xf32>
    %cst_32 = arith.constant 0.199777111 : f32
    %184 = vector.broadcast %cst_32 : f32 to vector<2x8x128xf32>
    %185 = arith.addf %183, %184 : vector<2x8x128xf32>
    %186 = arith.mulf %185, %178 : vector<2x8x128xf32>
    %cst_33 = arith.constant 0.333329499 : f32
    %187 = vector.broadcast %cst_33 : f32 to vector<2x8x128xf32>
    %188 = arith.subf %186, %187 : vector<2x8x128xf32>
    %189 = arith.mulf %188, %178 : vector<2x8x128xf32>
    %190 = arith.mulf %189, %177 : vector<2x8x128xf32>
    %191 = arith.addf %190, %177 : vector<2x8x128xf32>
    %192 = arith.addf %154, %191 : vector<2x8x128xf32>
    %193 = arith.mulf %142, %192 : vector<2x8x128xf32>
    %194 = vector.extract_strided_slice %193 {offsets = [0, 0, 0], sizes = [1, 8, 128], strides = [1, 1, 1]} : vector<2x8x128xf32> to vector<1x8x128xf32>
    %195 = vector.shape_cast %194 : vector<1x8x128xf32> to vector<8x128xf32>
    %196 = vector.extract_strided_slice %193 {offsets = [1, 0, 0], sizes = [1, 8, 128], strides = [1, 1, 1]} : vector<2x8x128xf32> to vector<1x8x128xf32>
    %197 = vector.shape_cast %196 : vector<1x8x128xf32> to vector<8x128xf32>
    %198 = arith.subf %195, %197 : vector<8x128xf32>
    %199 = arith.mulf %198, %198 : vector<8x128xf32>
    %cst_34 = arith.constant 0.405284733 : f32
    %200 = vector.broadcast %cst_34 : f32 to vector<8x128xf32>
    %201 = arith.mulf %200, %199 : vector<8x128xf32>
    %cst_35 = arith.constant 1.000000e+00 : f32
    %202 = vector.broadcast %cst_35 : f32 to vector<8x128xf32>
    %203 = arith.subf %202, %66 : vector<8x128xf32>
    %204 = arith.addf %203, %201 : vector<8x128xf32>
    %cst_36 = arith.constant 1.000000e-07 : f32
    %205 = vector.broadcast %cst_36 : f32 to vector<8x128xf32>
    %206 = arith.addf %204, %205 : vector<8x128xf32>
    %207 = tpu.reciprocal %206 {approx = true} : vector<8x128xf32> -> vector<8x128xf32>
    %208 = arith.mulf %206, %207 : vector<8x128xf32>
    %cst_37 = arith.constant 2.000000e+00 : f32
    %209 = vector.broadcast %cst_37 : f32 to vector<8x128xf32>
    %210 = arith.subf %209, %208 : vector<8x128xf32>
    %211 = arith.mulf %207, %210 : vector<8x128xf32>
    %212 = arith.mulf %201, %211 : vector<8x128xf32>
    %213 = arith.mulf %212, %201 : vector<8x128xf32>
    %214 = arith.addf %125, %213 : vector<8x128xf32>
    %215 = arith.subf %11, %12 : vector<4x8x128xf32>
    %216 = arith.mulf %215, %215 : vector<4x8x128xf32>
    %cst_38 = arith.constant dense<0.000000e+00> : vector<8x128xf32>
    %217 = vector.multi_reduction <add>, %216, %cst_38 [0] : vector<4x8x128xf32> to vector<8x128xf32>
    %218 = vector.shape_cast %217 : vector<8x128xf32> to vector<1x8x128xf32>
    %219 = vector.shape_cast %125 : vector<8x128xf32> to vector<1x8x128xf32>
    %220 = vector.shape_cast %214 : vector<8x128xf32> to vector<1x8x128xf32>
    %221 = vector.shape_cast %83 : vector<8x128xf32> to vector<1x8x128xf32>
    %222 = tpu.concatenate %218, %219, %220, %221 in 0 : vector<1x8x128xf32>, vector<1x8x128xf32>, vector<1x8x128xf32>, vector<1x8x128xf32> -> vector<4x8x128xf32>
    %223 = vector.shape_cast %10 : vector<8x128xf32> to vector<1x8x128xf32>
    %224 = vector.broadcast %223 : vector<1x8x128xf32> to vector<4x8x128xf32>
    %225 = arith.mulf %222, %224 : vector<4x8x128xf32>
    %cst_39 = arith.constant dense<0.000000e+00> : vector<4x128xf32>
    %226 = vector.multi_reduction <add>, %225, %cst_39 [1] : vector<4x8x128xf32> to vector<4x128xf32>
    %cst_40 = arith.constant dense<0.000000e+00> : vector<4xf32>
    %227 = vector.multi_reduction <add>, %226, %cst_40 [1] : vector<4x128xf32> to vector<4xf32>
    %228 = vector.shape_cast %227 : vector<4xf32> to vector<4x1xf32>
    %c1_i32 = arith.constant 1 : i32
    %229 = arith.maxsi %0, %c1_i32 : i32
    %230 = arith.sitofp %229 : i32 to f32
    %231 = tpu.iota {dimensions = array<i32: 0>} : vector<4x1xi32>
    %c0_i32 = arith.constant 0 : i32
    %232 = vector.broadcast %c0_i32 : i32 to vector<4x1xi32>
    %233 = arith.cmpi eq, %231, %232 : vector<4x1xi32>
    %cst_41 = arith.constant 4.000000e+00 : f32
    %234 = arith.mulf %cst_41, %230 : f32
    %cst_42 = arith.constant 1.000000e+00 : f32
    %235 = vector.broadcast %234 : f32 to vector<4x1xf32>
    %236 = vector.broadcast %cst_42 : f32 to vector<4x1xf32>
    %237 = arith.select %233, %235, %236 : vector<4x1xi1>, vector<4x1xf32>
    %238 = arith.divf %228, %237 : vector<4x1xf32>
    %c0_43 = arith.constant 0 : index
    %c0_44 = arith.constant 0 : index
    %239 = vector.load %arg2[%c0_43, %c0_44] : memref<4x1xf32, #tpu.memory_space<vmem>>, vector<4x1xf32>
    tpu.vector_store %arg2[%c0_43, %c0_44], %238 {strides = array<i32>} : memref<4x1xf32, #tpu.memory_space<vmem>>, vector<4x1xf32>,
    return
  }
}

</mosaic_0001>

<bundles_post_ra>
// kernel: _localizer_loss.1
= control target key start
LH: loop header
LB: loop body
LE: loop exit
PB: predicated region body
PF: predicated region fallthrough
CT: control target
= control target key end

     0   :  { %v21_v0 = vlaneseq  ;;  %vm285_vm8 = vmmov 1   ;;  %vm226_vm11 = vcmask 1041409   ;;  %s437_s0 = inlined_call_operand.<no memory space> [shape: s32[1], index: 0, kind: input, shape index: {}]   ;;  %s438_s1 = inlined_call_operand.vmem [shape: f32[8,8,128], index: 1, kind: input, shape index: {}]   ;;  %s439_s2 = inlined_call_operand.vmem [shape: f32[4,1], index: 2, kind: output, shape index: {}]  }
   0x1   :  { %v13_v1 = vld [vmem:[%s438_s1] sm:$0xff]  ;;  %v14_v2 = vld [vmem:[%s438_s1 + $0x8] sm:$0xff]  ;;  %v15_v3 = vld [vmem:[%s438_s1 + $0x10] sm:$0xff]  ;;  %v27_v4 = vstv %s437_s0  ;;  %p237_p0 = scmp.gt.s32.totalorder %s437_s0, 1 }
   0x2   :  { %v16_v5 = vld [vmem:[%s438_s1 + $0x18] sm:$0xff]  ;;  %v17_v6 = vld [vmem:[%s438_s1 + $0x20] sm:$0xff]  ;;  %v18_v7 = vld [vmem:[%s438_s1 + $0x28] sm:$0xff]  ;;  %v323_v8 = vshrl.u32 %v21_v0, 7  ;;  %v24_v9 = vand.u32 127, %v21_v0  ;;  %v325_v10 = vsub.f32 %v15_v3, %v13_v1  ;;  %v76_v11 = vadd.f32 %v15_v3, %v13_v1 }
   0x3   :  { %v19_v12 = vld [vmem:[%s438_s1 + $0x30] sm:$0xff]  ;;  %v20_v13 = vld [vmem:[%s438_s1 + $0x38] sm:$0xff]  ;;  %v31_v14 = vmax.f32 %v13_v1, %v17_v6  ;;  %v32_v15 = vmax.f32 %v14_v2, %v18_v7  ;;  %v35_v16 = vmin.f32 %v13_v1, %v17_v6  ;;  %v36_v17 = vmin.f32 %v14_v2, %v18_v7  ;;  %s447_s0 = smov (!%p237_p0, %s437_s0), 1 }
   0x4   :  { %v25_v18 = vmul.u32 128, %v323_v8  ;;  %v33_v19 = vmin.f32 %v15_v3, %v19_v12  ;;  %v34_v20 = vmin.f32 %v16_v5, %v20_v13  ;;  %v37_v21 = vmax.f32 %v15_v3, %v19_v12  ;;  %s239_s30 = scvt.s32.f32 %s447_s0 }
   0x5   :  { %v38_v22 = vmax.f32 %v16_v5, %v20_v13  ;;  %v40_v23 = vsub.f32 %v16_v5, %v14_v2  ;;  %v41_v24 = vsub.f32 %v19_v12, %v17_v6  ;;  %v42_v25 = vsub.f32 %v20_v13, %v18_v7 }
   0x6   :  { %v26_v26 = vadd.s32 %v25_v18, %v24_v9  ;;  %v43_v27 = vsub.f32 %v33_v19, %v31_v14  ;;  %v44_v28 = vsub.f32 %v34_v20, %v32_v15  ;;  %v45_v29 = vsub.f32 %v37_v21, %v35_v16  ;;  %s241_s3 = smul.f32 4.0, %s239_s30 }
   0x7   :  { %v46_v30 = vsub.f32 %v38_v22, %v36_v17  ;;  %v52_v31 = vmul.f32 %v40_v23, %v325_v10  ;;  %v53_v32 = vmul.f32 %v42_v25, %v41_v24  ;;  %v77_v33 = vadd.f32 %v16_v5, %v14_v2 }
   0x8   :  { %vm335_vm0 = vcmp.lt.s32.totalorder %v26_v26, %v27_v4  ;;  %vm47_vm1 = vcmp.gt.f32.partialorder %v43_v27, 0.0  ;;  %vm48_vm2 = vcmp.gt.f32.partialorder %v44_v28, 0.0  ;;  %v50_v35 = vmul.f32 %v44_v28, %v43_v27 }
   0x9   :  { %vm49_vm3 = vmand %vm47_vm1, %vm48_vm2  ;;  %v54_v36 = vadd.f32 %v53_v32, %v52_v31  ;;  %v62_v37 = vmul.f32 %v46_v30, %v45_v29  ;;  %v72_v38 = vmul.f32 %v45_v29, %v45_v29  ;;  %v73_v40 = vmul.f32 %v46_v30, %v46_v30 }
   0xa   :  { %v51_v39 = vsel %vm49_vm3, %v50_v35, 0.0  ;;  %v78_v41 = vadd.f32 %v19_v12, %v17_v6  ;;  %v79_v42 = vadd.f32 %v20_v13, %v18_v7  ;;  %v93_v45 = vsel %vm335_vm0, %v42_v25, 1.0 }
   0xb   :  { %v55_v43 = vsub.f32 %v54_v36, %v51_v39  ;;  %v65_v44 = vadd.f32 1e-07, %v62_v37  ;;  %v94_v46 = vsel %vm335_vm0, %v40_v23, 1.0  ;;  %v74_v47 = vadd.f32 %v73_v40, %v72_v38 }
   0xc   :  { %v80_v48 = vsub.f32 %v76_v11, %v78_v41  ;;  %v81_v49 = vsub.f32 %v77_v33, %v79_v42  ;;  %262 = vrcp.f32 %v93_v45  ;;  %v183_v51 = vsub.f32 %v13_v1, %v17_v6 }
   0xd   :  { %v56_v50 = vadd.f32 1e-07, %v55_v43  ;;  %264 = vrcp.f32 %v65_v44  ;;  %v75_v52 = vadd.f32 1e-07, %v74_v47  ;;  %v184_v55 = vsub.f32 %v14_v2, %v18_v7 }
   0xe   :  { %v82_v53 = vmul.f32 %v80_v48, %v80_v48  ;;  %v83_v54 = vmul.f32 %v81_v49, %v81_v49  ;;  %266 = vrcp.f32 %v94_v46  ;;  %v185_v56 = vsub.f32 %v15_v3, %v19_v12 }
   0xf   :  { %268 = vrcp.f32 %v56_v50  ;;  %v186_v57 = vsub.f32 %v16_v5, %v20_v13  ;;  %v187_v59 = vmul.f32 %v183_v51, %v183_v51  ;;  %v188_v60 = vmul.f32 %v184_v55, %v184_v55 }
  0x10   :  { %v84_v58 = vadd.f32 %v83_v54, %v82_v53  ;;  %270 = vrcp.f32 %v75_v52  ;;  %v189_v61 = vmul.f32 %v185_v56, %v185_v56  ;;  %v284_v9 = vmov 0.0  }
  0x11   :  { %v190_v62 = vmul.f32 %v186_v57, %v186_v57  ;;  %v191_v63 = vadd.f32 %v188_v60, %v187_v59  ;;  %v346_v1 = vsel %vm335_vm0, 1.0, %v284_v9  ;;  %v64_v21 = vsub.f32 %v62_v37, %v55_v43 }
  0x12   :  { %v85_v23 = vmul.f32 0.25, %v84_v58  ;;  %vm228_vm0 = vcmask 1042434   ;;  %vm230_vm1 = vcmask 1043459   ;;  %vm233_vm2 = vcmask 1043456  }
  0x13   :  { %v192_v0 = vadd.f32 %v191_v63, %v189_v61  ;;  %vm240_vm3 = vcmp.eq.s32.totalorder %v323_v8, 0 }
  0x15   :  { %v193_v2 = vadd.f32 %v192_v0, %v190_v62 }
  0x16   :  { %v263_v4 = vpop.eup %262 }
  0x17   :  { %v265_v6 = vpop.eup %264  ;;  %v348_v11 = vmul.f32 %v263_v4, %v41_v24  ;;  %v194_v13 = vmul.f32 %v346_v1, %v193_v2 }
  0x18   :  { %v267_v3 = vpop.eup %266  ;;  %v67_v5 = vmul.f32 %v265_v6, %v65_v44 }
  0x19   :  { %v269_v7 = vpop.eup %268  ;;  %v351_v12 = vmul.f32 %v267_v3, %v325_v10  ;;  %v355_v17 = vand.u32 2147483647, %v348_v11  ;;  %v198_v34 = vrot.slane %v194_v13, 4  ;;  %vm99_vm14 = vcmp.lt.f32.partialorder %v348_v11, 0.0 }
  0x1a   :  { %v271_v14 = vpop.eup %270  ;;  %v58_v15 = vmul.f32 %v269_v7, %v56_v50  ;;  %v68_v16 = vsub.f32 2.0, %v67_v5 }
  0x1b   :  { %v87_v18 = vmul.f32 %v271_v14, %v75_v52  ;;  %v358_v19 = vand.u32 2147483647, %v351_v12  ;;  %v117_v10 = vadd.f32 1e-30, %v355_v17  ;;  %v131_v30 = vadd.f32 1.0, %v355_v17 }
  0x1c   :  { %v59_v20 = vsub.f32 2.0, %v58_v15  ;;  %v69_v22 = vmul.f32 %v265_v6, %v68_v16  ;;  %v199_v37 = vadd.f32 %v198_v34, %v194_v13  ;;  %vm105_vm4 = vcmp.gt.f32.partialorder %v355_v17, 2.4142137 }
  0x1d   :  { %v88_v24 = vsub.f32 2.0, %v87_v18  ;;  %v118_v27 = vadd.f32 1e-30, %v358_v19  ;;  %272 = vrcp.f32 %v117_v10  ;;  %v132_v32 = vadd.f32 1.0, %v358_v19  ;;  %vm109_vm9 = vmxor %vm105_vm4, %vm285_vm8 }
  0x1e   :  { %v60_v25 = vmul.f32 %v269_v7, %v59_v20  ;;  %v70_v29 = vmul.f32 %v69_v22, %v64_v21  ;;  %v200_v40 = vrot.slane %v199_v37, 2  ;;  %vm106_vm5 = vcmp.gt.f32.partialorder %v358_v19, 2.4142137 }
  0x1f   :  { %v89_v26 = vmul.f32 %v271_v14, %v88_v24  ;;  %274 = vrcp.f32 %v118_v27  ;;  %vm107_vm6 = vcmp.gt.f32.partialorder %v355_v17, 0.41421357  ;;  %vm108_vm7 = vcmp.gt.f32.partialorder %v358_v19, 0.41421357  ;;  %vm110_vm10 = vmxor %vm106_vm5, %vm285_vm8 }
  0x20   :  { %v61_v28 = vmul.f32 %v60_v25, %v51_v39  ;;  %276 = vrcp.f32 %v131_v30  ;;  %v201_v41 = vadd.f32 %v200_v40, %v199_v37  ;;  %v253_v58 = vadd.f32 -1.0, %v355_v17  ;;  %vm387_vm12 = vmand %vm107_vm6, %vm109_vm9 }
  0x21   :  { %v90_v31 = vmul.f32 %v89_v26, %v85_v23  ;;  %278 = vrcp.f32 %v132_v32  ;;  %v254_v59 = vadd.f32 -1.0, %v358_v19  ;;  %vm393_vm13 = vmand %vm108_vm7, %vm110_vm10  ;;  %vm100_vm15 = vcmp.lt.f32.partialorder %v351_v12, 0.0 }
  0x22   :  { %v364_v33 = vsub.f32 1.0, %v61_v28  ;;  %v202_v49 = vrot.slane %v201_v41, 1 }
  0x24   :  { %v71_v35 = vadd.f32 %v70_v29, %v364_v33  ;;  %v368_v36 = vadd.f32 %v90_v31, %v364_v33  ;;  %v203_v63 = vadd.f32 %v202_v49, %v201_v41  ;;  %v114_v41 = vsel %vm393_vm13, 0.7853982, %v284_v9 }
  0x26   :  { %v195_v38 = vmul.f32 %v346_v1, %v368_v36  ;;  %v373_v39 = vmul.f32 %v346_v1, %v71_v35 }
  0x27   :  { %v273_v43 = vpop.eup %272 }
  0x28   :  { %v204_v42 = vrot.slane %v195_v38, 4  ;;  %v121_v46 = vmul.f32 %v273_v43, %v117_v10 }
  0x29   :  { %v275_v45 = vpop.eup %274 }
  0x2a   :  { %v205_v44 = vadd.f32 %v204_v42, %v195_v38  ;;  %v277_v47 = vpop.eup %276  ;;  %v122_v48 = vmul.f32 %v275_v45, %v118_v27  ;;  %v123_v52 = vsub.f32 2.0, %v121_v46  ;;  %v113_v38 = vsel %vm387_vm12, 0.7853982, %v284_v9 }
  0x2b   :  { %v279_v51 = vpop.eup %278  ;;  %v135_v53 = vmul.f32 %v277_v47, %v131_v30  ;;  %v116_v46 = vsel %vm106_vm5, 1.5707964, %v114_v41 }
  0x2c   :  { %v206_v50 = vrot.slane %v205_v44, 2  ;;  %v124_v54 = vsub.f32 2.0, %v122_v48  ;;  %v136_v55 = vmul.f32 %v279_v51, %v132_v32  ;;  %v125_v57 = vmul.f32 %v273_v43, %v123_v52 }
  0x2d   :  { %v137_v60 = vsub.f32 2.0, %v135_v53  ;;  %v286_v48 = vmov 1.0  }
  0x2e   :  { %v207_v56 = vadd.f32 %v206_v50, %v205_v44  ;;  %v126_v61 = vmul.f32 %v275_v45, %v124_v54  ;;  %v138_v62 = vsub.f32 2.0, %v136_v55  ;;  %v127_v2 = vsub.f32 0.0, %v125_v57 }
  0x2f   :  { %v139_v4 = vmul.f32 %v277_v47, %v137_v60  ;;  %v115_v44 = vsel %vm105_vm4, 1.5707964, %v113_v38  ;;  %v101_v49 = vsel %vm99_vm14, -1.0, %v286_v48 }
  0x30   :  { %v208_v0 = vrot.slane %v207_v56, 1  ;;  %v140_v3 = vmul.f32 %v279_v51, %v138_v62  ;;  %v128_v13 = vsub.f32 0.0, %v126_v61  ;;  %v102_v51 = vsel %vm100_vm15, -1.0, %v286_v48 }
  0x31   :  { %v141_v14 = vmul.f32 %v253_v58, %v139_v4 }
  0x32   :  { %v209_v5 = vadd.f32 %v208_v0, %v207_v56  ;;  %v142_v15 = vmul.f32 %v254_v59, %v140_v3  ;;  %v216_v59 = vrot.slane %v373_v39, 4 }
  0x33   :  { %v143_v18 = vsel %vm387_vm12, %v141_v14, %v355_v17 }
  0x34   :  { %v397_v16 = vsel %vm226_vm11, %v209_v5, %v203_v63  ;;  %v144_v20 = vsel %vm393_vm13, %v142_v15, %v358_v19  ;;  %v145_v21 = vsel %vm105_vm4, %v127_v2, %v143_v18  ;;  %v217_v62 = vadd.f32 %v216_v59, %v373_v39 }
  0x35   :  { %v146_v22 = vsel %vm106_vm5, %v128_v13, %v144_v20  ;;  %v147_v23 = vmul.f32 %v145_v21, %v145_v21  ;;  %vm246_vm4 = vcmask 3072  }
  0x36   :  { %v148_v24 = vmul.f32 %v146_v22, %v146_v22  ;;  %v218_v4 = vrot.slane %v217_v62, 2 }
  0x37   :  { %v149_v25 = vmul.f32 0.080537446, %v147_v23 }
  0x38   :  { %v150_v10 = vmul.f32 0.080537446, %v148_v24  ;;  %v219_v3 = vadd.f32 %v218_v4, %v217_v62 }
  0x39   :  { %v255_v26 = vadd.f32 -0.13877685, %v149_v25 }
  0x3a   :  { %v256_v27 = vadd.f32 -0.13877685, %v150_v10  ;;  %v220_v7 = vrot.slane %v219_v3, 1 }
  0x3b   :  { %v153_v28 = vmul.f32 %v255_v26, %v147_v23 }
  0x3c   :  { %v154_v29 = vmul.f32 %v256_v27, %v148_v24  ;;  %v221_v15 = vadd.f32 %v220_v7, %v219_v3 }
  0x3d   :  { %v155_v30 = vadd.f32 0.19977711, %v153_v28 }
  0x3e   :  { %v156_v31 = vadd.f32 0.19977711, %v154_v29 }
  0x3f   :  { %v157_v32 = vmul.f32 %v155_v30, %v147_v23 }
  0x40   :  { %v158_v34 = vmul.f32 %v156_v31, %v148_v24 }
  0x41   :  { %v257_v35 = vadd.f32 -0.3333295, %v157_v32 }
  0x42   :  { %v258_v37 = vadd.f32 -0.3333295, %v158_v34 }
  0x43   :  { %v161_v40 = vmul.f32 %v257_v35, %v147_v23 }
  0x44   :  { %v162_v42 = vmul.f32 %v258_v37, %v148_v24 }
  0x45   :  { %v163_v43 = vmul.f32 %v161_v40, %v145_v21 }
  0x46   :  { %v164_v45 = vmul.f32 %v162_v42, %v146_v22 }
  0x47   :  { %v165_v47 = vadd.f32 %v163_v43, %v145_v21 }
  0x48   :  { %v166_v50 = vadd.f32 %v164_v45, %v146_v22 }
  0x49   :  { %v167_v52 = vadd.f32 %v165_v47, %v115_v44 }
  0x4a   :  { %v168_v9 = vadd.f32 %v166_v50, %v116_v46 }
  0x4b   :  { %v169_v53 = vmul.f32 %v167_v52, %v101_v49 }
  0x4c   :  { %v170_v54 = vmul.f32 %v168_v9, %v102_v51 }
  0x4e   :  { %v171_v11 = vsub.f32 %v169_v53, %v170_v54 }
  0x50   :  { %v172_v55 = vmul.f32 %v171_v11, %v171_v11 }
  0x52   :  { %v173_v56 = vmul.f32 0.40528473, %v172_v55 }
  0x54   :  { %v174_v12 = vadd.f32 %v173_v56, %v364_v33 }
  0x56   :  { %v175_v17 = vadd.f32 1e-07, %v174_v12 }
  0x58   :  { %280 = vrcp.f32 %v175_v17 }
  0x62   :  { %v281_v57 = vpop.eup %280 }
  0x63   :  { %v177_v58 = vmul.f32 %v281_v57, %v175_v17 }
  0x65   :  { %v178_v19 = vsub.f32 2.0, %v177_v58 }
  0x67   :  { %v179_v60 = vmul.f32 %v281_v57, %v178_v19 }
  0x69   :  { %v180_v61 = vmul.f32 %v179_v60, %v173_v56 }
  0x6b   :  { %v181_v63 = vmul.f32 %v180_v61, %v173_v56 }
  0x6d   :  { %v182_v0 = vadd.f32 %v181_v63, %v368_v36 }
  0x6f   :  { %v196_v6 = vmul.f32 %v346_v1, %v182_v0  ;;  %v242_v1 = vstv %s241_s3 }
  0x70   :  { %v243_v36 = vsel %vm240_vm3, %v242_v1, 1.0 }
  0x71   :  { %v210_v2 = vrot.slane %v196_v6, 4  ;;  %282 = vrcp.f32 %v243_v36 }
  0x73   :  { %v211_v33 = vadd.f32 %v210_v2, %v196_v6 }
  0x75   :  { %v212_v5 = vrot.slane %v211_v33, 2 }
  0x77   :  { %v213_v13 = vadd.f32 %v212_v5, %v211_v33 }
  0x79   :  { %v214_v14 = vrot.slane %v213_v13, 1 }
  0x7b   :  { %v215_v18 = vadd.f32 %v214_v14, %v213_v13  ;;  %v283_v22 = vpop.eup %282 }
  0x7d   :  { %v229_v39 = vsel %vm228_vm0, %v215_v18, %v397_v16 }
  0x7e   :  { %v231_v20 = vsel %vm230_vm1, %v221_v15, %v229_v39 }
  0x7f   :  { %v234_v21 = vsel %vm233_vm2, %v231_v20, 0.0 }
  0x80   :  { %235 = vadd.xlane.f32.xlu0 %v234_v21 }
 0x10d   :  { %v236_v16 = vpop.xlane.xlu0 %235 }
 0x10e   :  { %v245_v23 = vmul.f32 %v283_v22, %v236_v16 }
 0x110   :  { %247 = vst.msk [vmem:[%s439_s2] sm:$0xf] %vm246_vm4, %v245_v23 }

</bundles_post_ra>
